<compile_context>
chip_gen: v5e
topology: v5e:2x2
jax: 0.10.0
libtpu: 0.0.40
codegen_flags: <defaults>
</compile_context>

<pallas_src>
import jax
import jax.numpy as jnp
from jax.experimental import pallas as pl
from jax.experimental.pallas import tpu as pltpu


def _flatten_copy_kernel(x_hbm, o_hbm, sem):
    # One contiguous HBM->HBM DMA of the whole (B, flat) slab.
    # No VMEM staging, no tiling, no masked stores.
    copy = pltpu.make_async_copy(x_hbm, o_hbm, sem)
    copy.start()
    copy.wait()


def linear_view(x: jax.Array, *, use_kernel: bool = True) -> jax.Array:
    """Pallas equivalent of LinearView.forward: x.view(B, -1)."""
    b = x.shape[0]
    flat = 1
    for d in x.shape[1:]:
        flat *= d

    # Row-major flatten: metadata-only for a contiguous array. This IS the
    # entire semantic content of LinearView.forward.
    x2 = x.reshape(b, flat)

    if not use_kernel:
        # Recommended production path: the view is free; skip the HBM
        # round trip entirely.
        return x2

    itemsize = jnp.dtype(x.dtype).itemsize
    cost = pl.CostEstimate(
        flops=0,
        transcendentals=0,
        bytes_accessed=2 * b * flat * itemsize,
    )

    return pl.pallas_call(
        _flatten_copy_kernel,
        out_shape=jax.ShapeDtypeStruct((b, flat), x.dtype),
        # Leave both operands in HBM; the kernel issues the DMA itself.
        in_specs=[pl.BlockSpec(memory_space=pl.ANY)],
        out_specs=pl.BlockSpec(memory_space=pl.ANY),
        scratch_shapes=[pltpu.SemaphoreType.DMA(())],
        cost_estimate=cost,
    )(x2)


if __name__ == "__main__":
    key = jax.random.PRNGKey(0)
    # NCHW input consistent with a conv feature map feeding LinearView.
    x = jax.random.normal(key, (2, 4, 16, 16), dtype=jnp.float32)

    y = linear_view(x)            # kernel path (single HBM->HBM DMA)
    y = jax.block_until_ready(y)

    # Reference: row-major reshape == torch .view for contiguous NCHW.
    y_ref = x.reshape(x.shape[0], -1)
    assert y.shape == (2, 4 * 16 * 16), y.shape
    assert jnp.array_equal(y, y_ref), "mismatch vs reference flatten"

    # Also exercise the recommended metadata-only path.
    y_free = jax.block_until_ready(linear_view(x, use_kernel=False))
    assert jnp.array_equal(y_free, y_ref)

    print("KERNEL_OK")
</pallas_src>

<mosaic_0001>
module attributes {stable_mosaic.version = 11 : i64} {
  func.func @_flatten_copy_kernel(%arg0: memref<2x1024xf32, #tpu.memory_space<any>>, %arg1: memref<2x1024xf32, #tpu.memory_space<any>>, %arg2: memref<!tpu.dma_semaphore, #tpu.memory_space<semaphore_mem>>) attributes {dimension_semantics = [], scalar_prefetch = 0 : i64, scratch_operands = 1 : i64, tpu.core_type = #tpu.core_type<tc>} {
    tpu.enqueue_dma source(%arg0 : memref<2x1024xf32, #tpu.memory_space<any>>) target(%arg1 : memref<2x1024xf32, #tpu.memory_space<any>>) target_semaphore(%arg2 : memref<!tpu.dma_semaphore, #tpu.memory_space<semaphore_mem>>)
    tpu.wait_dma2 semaphore(%arg2 : memref<!tpu.dma_semaphore, #tpu.memory_space<semaphore_mem>>) src(%arg0 : memref<2x1024xf32, #tpu.memory_space<any>>) dst(%arg1 : memref<2x1024xf32, #tpu.memory_space<any>>)
    return
  }
}

</mosaic_0001>

<bundles_post_ra>
// kernel: tpu_custom_call.1
= control target key start
LH: loop header
LB: loop body
LE: loop exit
PB: predicated region body
PF: predicated region fallthrough
CT: control target
= control target key end

     0   :  { %s33_s12 = smov [#allocation2]   ;;  %s34_s13 = smov [#allocation3]   ;;  %s52_s0 = inlined_call_operand.hbm [shape: f32[2,1024], index: 0, kind: input, shape index: {}]   ;;  %s53_s1 = inlined_call_operand.hbm [shape: f32[2,1024], index: 1, kind: output, shape index: {}]  }
   0x1   :  { %s10_s8 = sshll.u32 %s52_s0, 4  ;;  %s12_s11 = sshll.u32 %s53_s1, 4  ;;  %s11_s8 = int_to_ptr.hbm [resolvable:$true] %s10_s8  ;;  %s13_s11 = int_to_ptr.hbm [resolvable:$true] %s12_s11 }
   0x2   :  { %s35_s14 = smov 0  }
   0x3   :  { %16 = dma.general %s11_s8, 256, %s13_s11, %s33_s12, %s34_s13, [#allocation4], %s35_s14, 0  }
   0x4   :  { %31 = dma.done.wait [#allocation2], 256 }
   0x5   :  { %32 = vsyncadd [#allocation2], 4294967040 }
   0x6   :  { %21 = vsyncmov [#allocation2] }
   0x9   :  { %s22_s15 = vpop.sfrf %21 }
   0xa   :  { %p27_p0 = scmp.ne.s32.totalorder %s22_s15, 0 }
   0xc   :  { %26 = shalt.err (%p27_p0)  }

</bundles_post_ra>
